<compile_context>
chip_gen: v7x
topology: tpu7x:2x2x1
jax: 0.10.0
libtpu: 0.0.40
codegen_flags: <defaults>
</compile_context>

<pallas_src>
import functools

import jax
import jax.numpy as jnp
from jax.experimental import pallas as pl
from jax.experimental.pallas import tpu as pltpu


def _fc_kernel(xin_ref, xst_ref, win_ref, wst_ref, b_ref, o_ref):
    # xin: [tm, Din], xst: [tm, Dh], win: [Din, Dout], wst: [Dh, Dout],
    # b: [1, Dout], o: [tm, Dout]
    acc = jnp.dot(xin_ref[...], win_ref[...], preferred_element_type=jnp.float32)
    acc = acc + jnp.dot(xst_ref[...], wst_ref[...],
                        preferred_element_type=jnp.float32)
    # NOTE: bias added AFTER sigmoid, exactly as in the PyTorch module.
    o_ref[...] = (jax.nn.sigmoid(acc) + b_ref[...]).astype(o_ref.dtype)


def _row_tile(M, target=2048):
    """Largest row tile <= target that divides M and is a multiple of 8."""
    if M <= target or M % 8 != 0:
        return M
    tm = target - (target % 8)
    while tm >= 8:
        if M % tm == 0:
            return tm
        tm -= 8
    return M


def fc_pallas(x_in, x_st, w_in, w_st, bias):
    """x_in: [M, Din], x_st: [M, Dh], w_in: [Din, Dout], w_st: [Dh, Dout],
    bias: [Dout] -> [M, Dout] float32 (= sigmoid(x@W) + bias)."""
    M, din = x_in.shape
    dh = x_st.shape[1]
    dout = w_in.shape[1]
    bias2d = bias.reshape(1, dout)

    tm = _row_tile(M)
    grid = (M // tm,)

    k = din + dh
    cost = pl.CostEstimate(
        flops=2 * M * k * dout,
        transcendentals=M * dout,
        bytes_accessed=4 * (M * k + k * dout + dout + M * dout),
    )

    return pl.pallas_call(
        _fc_kernel,
        out_shape=jax.ShapeDtypeStruct((M, dout), jnp.float32),
        grid_spec=pltpu.PrefetchScalarGridSpec(
            num_scalar_prefetch=0,
            grid=grid,
            in_specs=[
                pl.BlockSpec((tm, din), lambda i: (i, 0)),   # inputs rows
                pl.BlockSpec((tm, dh), lambda i: (i, 0)),    # state rows
                pl.BlockSpec((din, dout), lambda i: (0, 0)), # W[:Din]  (resident)
                pl.BlockSpec((dh, dout), lambda i: (0, 0)),  # W[Din:]  (resident)
                pl.BlockSpec((1, dout), lambda i: (0, 0)),   # bias     (resident)
            ],
            out_specs=pl.BlockSpec((tm, dout), lambda i: (i, 0)),
        ),
        compiler_params=pltpu.CompilerParams(
            dimension_semantics=("parallel",),
        ),
        cost_estimate=cost,
    )(x_in, x_st, w_in, w_st, bias2d)


@functools.partial(jax.jit, static_argnames=("num_nodes", "output_dim"))
def _fc_forward(inputs, state, w_in, w_st, bias, *, num_nodes, output_dim):
    batch = inputs.shape[0]
    M = batch * num_nodes
    # Row-major splits of the last dim: free bitcasts under jit (no concat!).
    x_in = inputs.reshape(M, -1)
    x_st = state.reshape(M, -1)
    value = fc_pallas(x_in, x_st, w_in, w_st, bias)
    return value.reshape(batch, num_nodes * output_dim)  # free merge


class FCPallas:
    """JAX/Pallas equivalent of the PyTorch FC module from WKGTS."""

    def __init__(self, num_nodes, input_dim, hid_dim, output_dim,
                 bias_start=0.0, key=None):
        self._num_nodes = num_nodes
        self._input_dim = input_dim
        self._hid_dim = hid_dim
        self._output_dim = output_dim
        input_size = input_dim + hid_dim
        if key is None:
            key = jax.random.PRNGKey(0)
        # xavier_normal_: std = gain * sqrt(2 / (fan_in + fan_out)), gain = 1
        std = (2.0 / (input_size + output_dim)) ** 0.5
        self.weight = std * jax.random.normal(
            key, (input_size, output_dim), dtype=jnp.float32)
        self.biases = jnp.full((output_dim,), bias_start, dtype=jnp.float32)
        # Pre-split the weight so the concat never materializes
        # (two partial dots share one accumulator inside the kernel).
        self.w_in = self.weight[:input_dim]
        self.w_st = self.weight[input_dim:]

    def __call__(self, inputs, state):
        return _fc_forward(inputs, state, self.w_in, self.w_st, self.biases,
                           num_nodes=self._num_nodes,
                           output_dim=self._output_dim)


def _reference(inputs, state, weight, biases, num_nodes, output_dim):
    batch_size = inputs.shape[0]
    x = jnp.concatenate(
        [inputs.reshape(batch_size * num_nodes, -1),
         state.reshape(batch_size * num_nodes, -1)], axis=-1)
    value = jax.nn.sigmoid(x @ weight) + biases
    return value.reshape(batch_size, num_nodes * output_dim)


if __name__ == "__main__":
    batch = 2
    num_nodes = 16
    input_dim = 4
    hid_dim = 32
    output_dim = 8

    key = jax.random.PRNGKey(0)
    k_w, k_in, k_st = jax.random.split(key, 3)

    mod = FCPallas(num_nodes, input_dim, hid_dim, output_dim,
                   bias_start=0.0, key=k_w)

    inputs = jax.random.normal(k_in, (batch, num_nodes * input_dim),
                               dtype=jnp.float32)
    state = jax.random.normal(k_st, (batch, num_nodes * hid_dim),
                              dtype=jnp.float32)

    out = mod(inputs, state)
    jax.block_until_ready(out)

    ref = _reference(inputs, state, mod.weight, mod.biases,
                     num_nodes, output_dim)
    assert out.shape == (batch, num_nodes * output_dim)
    assert jnp.allclose(out, ref, atol=1e-5, rtol=1e-5)

    print("KERNEL_OK")
</pallas_src>

<mosaic_0001>
module attributes {stable_mosaic.version = 11 : i64} {
  func.func @_fc_kernel(%arg0: i32, %arg1: memref<32x4xf32, #tpu.memory_space<vmem>>, %arg2: memref<32x32xf32, #tpu.memory_space<vmem>>, %arg3: memref<4x8xf32, #tpu.memory_space<vmem>>, %arg4: memref<32x8xf32, #tpu.memory_space<vmem>>, %arg5: memref<1x8xf32, #tpu.memory_space<vmem>>, %arg6: memref<32x8xf32, #tpu.memory_space<vmem>>) attributes {dimension_semantics = [#tpu.dimension_semantics<parallel>], iteration_bounds = array<i64: 1>, scalar_prefetch = 0 : i64, scratch_operands = 0 : i64, tpu.core_type = #tpu.core_type<tc>, window_params = [{transform_indices = @transform_0, window_bounds = array<i64: 32, 4>}, {transform_indices = @transform_1, window_bounds = array<i64: 32, 32>}, {pipeline_mode = #tpu.pipeline_mode<synchronous>, transform_indices = @transform_2, window_bounds = array<i64: 4, 8>}, {pipeline_mode = #tpu.pipeline_mode<synchronous>, transform_indices = @transform_3, window_bounds = array<i64: 32, 8>}, {pipeline_mode = #tpu.pipeline_mode<synchronous>, transform_indices = @transform_4, window_bounds = array<i64: 1, 8>}, {transform_indices = @transform_5, window_bounds = array<i64: 32, 8>}]} {
    %c0 = arith.constant 0 : index
    %c0_0 = arith.constant 0 : index
    %0 = vector.load %arg1[%c0, %c0_0] : memref<32x4xf32, #tpu.memory_space<vmem>>, vector<32x4xf32>
    %c0_1 = arith.constant 0 : index
    %c0_2 = arith.constant 0 : index
    %1 = vector.load %arg3[%c0_1, %c0_2] : memref<4x8xf32, #tpu.memory_space<vmem>>, vector<4x8xf32>
    %cst = arith.constant dense<0.000000e+00> : vector<32x8xf32>
    %2 = tpu.matmul %0, %1, %cst {dimension_numbers = #tpu.dot_dimension_numbers<[1], [0], [0], [1], [0, 0, 1, 1], [], []>} : vector<32x4xf32>, vector<4x8xf32>, vector<32x8xf32> -> vector<32x8xf32>
    %c0_3 = arith.constant 0 : index
    %c0_4 = arith.constant 0 : index
    %3 = vector.load %arg2[%c0_3, %c0_4] : memref<32x32xf32, #tpu.memory_space<vmem>>, vector<32x32xf32>
    %c0_5 = arith.constant 0 : index
    %c0_6 = arith.constant 0 : index
    %4 = vector.load %arg4[%c0_5, %c0_6] : memref<32x8xf32, #tpu.memory_space<vmem>>, vector<32x8xf32>
    %cst_7 = arith.constant dense<0.000000e+00> : vector<32x8xf32>
    %5 = tpu.matmul %3, %4, %cst_7 {dimension_numbers = #tpu.dot_dimension_numbers<[1], [0], [0], [1], [0, 0, 1, 1], [], []>} : vector<32x32xf32>, vector<32x8xf32>, vector<32x8xf32> -> vector<32x8xf32>
    %6 = arith.addf %2, %5 : vector<32x8xf32>
    %7 = arith.negf %6 : vector<32x8xf32>
    %8 = math.exp %7 : vector<32x8xf32>
    %cst_8 = arith.constant 1.000000e+00 : f32
    %9 = vector.broadcast %cst_8 : f32 to vector<32x8xf32>
    %10 = arith.addf %9, %8 : vector<32x8xf32>
    %11 = arith.divf %9, %10 : vector<32x8xf32>
    %c0_9 = arith.constant 0 : index
    %c0_10 = arith.constant 0 : index
    %12 = vector.load %arg5[%c0_9, %c0_10] : memref<1x8xf32, #tpu.memory_space<vmem>>, vector<1x8xf32>
    %13 = vector.broadcast %12 : vector<1x8xf32> to vector<32x8xf32>
    %14 = arith.addf %11, %13 : vector<32x8xf32>
    %c0_11 = arith.constant 0 : index
    %c0_12 = arith.constant 0 : index
    %15 = vector.load %arg6[%c0_11, %c0_12] : memref<32x8xf32, #tpu.memory_space<vmem>>, vector<32x8xf32>
    tpu.vector_store %arg6[%c0_11, %c0_12], %14 {strides = array<i32>} : memref<32x8xf32, #tpu.memory_space<vmem>>, vector<32x8xf32>,
    return
  }
  func.func @transform_0(%arg0: i32) -> (i32, i32) {
    %c0_i32 = arith.constant 0 : i32
    %c0_i32_0 = arith.constant 0 : i32
    return %arg0, %c0_i32 : i32, i32
  }
  func.func @transform_1(%arg0: i32) -> (i32, i32) {
    %c0_i32 = arith.constant 0 : i32
    %c0_i32_0 = arith.constant 0 : i32
    return %arg0, %c0_i32 : i32, i32
  }
  func.func @transform_2(%arg0: i32) -> (i32, i32) {
    %c0_i32 = arith.constant 0 : i32
    %c0_i32_0 = arith.constant 0 : i32
    %c0_i32_1 = arith.constant 0 : i32
    return %c0_i32, %c0_i32_0 : i32, i32
  }
  func.func @transform_3(%arg0: i32) -> (i32, i32) {
    %c0_i32 = arith.constant 0 : i32
    %c0_i32_0 = arith.constant 0 : i32
    %c0_i32_1 = arith.constant 0 : i32
    return %c0_i32, %c0_i32_0 : i32, i32
  }
  func.func @transform_4(%arg0: i32) -> (i32, i32) {
    %c0_i32 = arith.constant 0 : i32
    %c0_i32_0 = arith.constant 0 : i32
    %c0_i32_1 = arith.constant 0 : i32
    return %c0_i32, %c0_i32_0 : i32, i32
  }
  func.func @transform_5(%arg0: i32) -> (i32, i32) {
    %c0_i32 = arith.constant 0 : i32
    %c0_i32_0 = arith.constant 0 : i32
    return %arg0, %c0_i32 : i32, i32
  }
}

</mosaic_0001>

<bundles_post_ra>
// kernel: _fc_forward.1
= control target key start
LH: loop header
LB: loop body
LE: loop exit
PB: predicated region body
PF: predicated region fallthrough
CT: control target
= control target key end

     0   :  { %vm144_vm0 = vcmask 1043456   ;;  %vm131_vm1 = vcmask 31744   ;;  %vm33_vm2 = vcmask 261120   ;;  %vm268_vm3 = vcmask 64512   ;;  %s448_s3 = inlined_call_operand.vmem [shape: f32[32,8], index: 3, kind: input, shape index: {}]   ;;  %s449_s2 = inlined_call_operand.vmem [shape: f32[4,8], index: 2, kind: input, shape index: {}]   ;;  %s450_s0 = inlined_call_operand.vmem [shape: f32[32,4], index: 0, kind: input, shape index: {}]   ;;  %s451_s1 = inlined_call_operand.vmem [shape: f32[32,32], index: 1, kind: input, shape index: {}]   ;;  %s452_s4 = inlined_call_operand.vmem [shape: f32[1,8], index: 4, kind: input, shape index: {}]   ;;  %s453_s5 = inlined_call_operand.vmem [shape: f32[32,8], index: 5, kind: output, shape index: {}]  }
   0x1   :  { %v29_v0 = vld [vmem:[%s448_s3] sm:$0xff]  ;;  %v30_v1 = vld [vmem:[%s448_s3 + $0x8] sm:$0xff]  ;;  %v31_v2 = vld [vmem:[%s448_s3 + $0x10] sm:$0xff] }
   0x2   :  { %v326_v3 = vpack.c.bf16 %v30_v1, %v29_v0  ;;  %v32_v4 = vld [vmem:[%s448_s3 + $0x18] sm:$0xff]  ;;  %v24_v5 = vld [vmem:[%s449_s2] sm:$0xf]  ;;  %v21_v9 = vld [vmem:[%s450_s0 + $0x8] sm:$0xff] }
   0x3   :  { %v20_v6 = vld [vmem:[%s450_s0] sm:$0xff]  ;;  %v330_v7 = vpack.c.bf16 %v32_v4, %v31_v2  ;;  %318 = vmatprep.subr.msk.mxu0 %vm144_vm0, %v24_v5  ;;  %v22_v10 = vld [vmem:[%s450_s0 + $0x10] sm:$0xff]  ;;  %v23_v11 = vld [vmem:[%s450_s0 + $0x18] sm:$0xff] }
   0x4   :  { %320 = vmatprep.mubr.msk.f32.mxu0 %vm131_vm1, %v20_v6  ;;  %v25_v8 = vld [vmem:[%s451_s1] sm:$0xff]  ;;  %327 = vmatprep.subr.bf16.mxu1 %v326_v3  ;;  %v26_v12 = vld [vmem:[%s451_s1 + $0x8] sm:$0xff]  ;;  %v27_v13 = vld [vmem:[%s451_s1 + $0x10] sm:$0xff] }
   0x5   :  { %319 = vmatpush3.msk.msra.mxu0 %vm144_vm0, %v24_v5  ;;  %329 = vmatpush3.bf16.msra.mxu1 %v326_v3  ;;  %v28_v14 = vld [vmem:[%s451_s1 + $0x18] sm:$0xff]  ;;  %v290_v39 = vld [vmem:[%s452_s4] ss:$0 sm:$0xff] }
   0x6   :  { %312 = vmatprep.mubr.msk.f32.mxu1 %vm33_vm2, %v25_v8  ;;  %331 = vmatprep.subr.bf16.mxu1 %v330_v7 }
   0x7   :  { %321 = vmatmul.mubr.msk.f32.vlgmr.msra.gmra.mrb[0].mxu0 %vm131_vm1, %v21_v9 }
   0x8   :  { %323 = vmatprep.mubr.msk.f32.mxu0 %vm131_vm1, %v22_v10 }
   0x9   :  { %333 = vmatpush3.bf16.msra.mxu1 %v330_v7 }
   0xb   :  { %324 = vmatmul.mubr.msk.f32.gmra.mrb[2].mxu0 %vm131_vm1, %v23_v11 }
   0xc   :  { %313 = vmatmul.mubr.msk.f32.vlgmr.msra.gmra.mrb[0].mxu1 %vm33_vm2, %v26_v12 }
   0xd   :  { %315 = vmatprep.mubr.msk.f32.mxu1 %vm33_vm2, %v27_v13 }
  0x10   :  { %316 = vmatmul.mubr.msk.f32.gmra.mrb[2].mxu1 %vm33_vm2, %v28_v14 }
  0xda   :  { %v322_v15 = vpop.f32.mrb[0].mxu0 }
  0xdb   :  { %v214_v16 = vpop.f32.mrb[1].mxu0 }
  0xde   :  { %v325_v17 = vpop.f32.mrb[2].mxu0 }
  0xdf   :  { %v224_v18 = vpop.f32.mrb[3].mxu0  ;;  %v314_v19 = vpop.f32.mrb[0].mxu1 }
  0xe0   :  { %v220_v20 = vadd.f32 %v322_v15, %v314_v19  ;;  %v112_v21 = vpop.f32.mrb[1].mxu1 }
  0xe1   :  { %v215_v22 = vadd.f32 %v214_v16, %v112_v21 }
  0xe2   :  { %v287_v23 = vmul.f32 -1.442695, %v220_v20 }
  0xe3   :  { %v286_v24 = vmul.f32 -1.442695, %v215_v22  ;;  %v317_v25 = vpop.f32.mrb[2].mxu1 }
  0xe4   :  { %338 = vpow2.f32 %v287_v23  ;;  %v230_v26 = vadd.f32 %v325_v17, %v317_v25  ;;  %v122_v27 = vpop.f32.mrb[3].mxu1 }
  0xe5   :  { %340 = vpow2.f32 %v286_v24  ;;  %v225_v28 = vadd.f32 %v224_v18, %v122_v27 }
  0xe6   :  { %v289_v29 = vmul.f32 -1.442695, %v230_v26 }
  0xe7   :  { %v288_v30 = vmul.f32 -1.442695, %v225_v28 }
  0xe8   :  { %342 = vpow2.f32 %v289_v29 }
  0xe9   :  { %344 = vpow2.f32 %v288_v30 }
  0xee   :  { %v339_v31 = vpop.eup %338 }
  0xef   :  { %v341_v32 = vpop.eup %340  ;;  %v246_v33 = vadd.f32 1.0, %v339_v31 }
  0xf0   :  { %v245_v34 = vadd.f32 1.0, %v341_v32 }
  0xf1   :  { %346 = vrcp.f32 %v246_v33 }
  0xf2   :  { %v343_v35 = vpop.eup %342  ;;  %348 = vrcp.f32 %v245_v34 }
  0xf3   :  { %v345_v36 = vpop.eup %344  ;;  %v248_v37 = vadd.f32 1.0, %v343_v35 }
  0xf4   :  { %v247_v38 = vadd.f32 1.0, %v345_v36 }
  0xf5   :  { %350 = vrcp.f32 %v248_v37 }
  0xf6   :  { %352 = vrcp.f32 %v247_v38 }
  0xfb   :  { %v347_v40 = vpop.eup %346 }
  0xfc   :  { %v349_v41 = vpop.eup %348  ;;  %v265_v42 = vadd.f32 %v347_v40, %v290_v39 }
  0xfd   :  { %v264_v43 = vadd.f32 %v349_v41, %v290_v39 }
  0xfe   :  { %270 = vst.msk [vmem:[%s453_s5 + $0x8] sm:$0xff] %vm268_vm3, %v265_v42 }
  0xff   :  { %v351_v44 = vpop.eup %350  ;;  %269 = vst.msk [vmem:[%s453_s5] sm:$0xff] %vm268_vm3, %v264_v43 }
 0x100   :  { %v353_v45 = vpop.eup %352  ;;  %v267_v46 = vadd.f32 %v351_v44, %v290_v39 }
 0x101   :  { %v266_v47 = vadd.f32 %v353_v45, %v290_v39 }
 0x102   :  { %272 = vst.msk [vmem:[%s453_s5 + $0x18] sm:$0xff] %vm268_vm3, %v267_v46 }
 0x103   :  { %271 = vst.msk [vmem:[%s453_s5 + $0x10] sm:$0xff] %vm268_vm3, %v266_v47 }

</bundles_post_ra>
